<compile_context>
chip_gen: v6e
topology: v6e:2x2x1
jax: 0.10.0
libtpu: 0.0.40
codegen_flags: <defaults>
</compile_context>

<pallas_src>
import jax
import jax.numpy as jnp
from jax.experimental import pallas as pl
from jax.experimental.pallas import tpu as pltpu

LANE = 128  # TPU lane width: hidden-dim padding target for dense MXU / vreg use.


def _round_up(n, m):
    return ((n + m - 1) // m) * m


def _mlp_kernel(x_ref, w1_ref, b1_ref, w2_ref, b2_ref,
                w3_ref, b3_ref, w4_ref, b4_ref, o_ref):
    # x and weights arrive as bf16; accumulate, bias-add and ReLU in f32.
    x = x_ref[...]
    h = jnp.dot(x, w1_ref[...], preferred_element_type=jnp.float32) + b1_ref[...]
    h = jnp.maximum(h, 0.0)
    h = jnp.dot(h.astype(jnp.bfloat16), w2_ref[...],
                preferred_element_type=jnp.float32) + b2_ref[...]
    h = jnp.maximum(h, 0.0)
    h = jnp.dot(h.astype(jnp.bfloat16), w3_ref[...],
                preferred_element_type=jnp.float32) + b3_ref[...]
    h = jnp.maximum(h, 0.0)
    out = jnp.dot(h.astype(jnp.bfloat16), w4_ref[...],
                  preferred_element_type=jnp.float32) + b4_ref[...]
    o_ref[...] = out.astype(o_ref.dtype)


def prepare_params(params):
    """One-time weight preparation: zero-pad hidden dims to the 128-lane width
    and cast weights to bf16 (biases stay f32). Zero padding is exact: padded
    hidden units are ReLU(0)=0 and padded weight rows are 0. Call once; reuse
    the result for every forward."""
    w1, b1, w2, b2, w3, b3, w4, b4 = params
    input_dim = w1.shape[0]
    inter_p = _round_up(w1.shape[1], LANE)
    num_classes = w4.shape[1]

    def pad2(a, rows, cols, dtype):
        return jnp.pad(a, ((0, rows - a.shape[0]), (0, cols - a.shape[1]))).astype(dtype)

    return (
        pad2(w1, input_dim, inter_p, jnp.bfloat16), pad2(b1, 1, inter_p, jnp.float32),
        pad2(w2, inter_p, inter_p, jnp.bfloat16),   pad2(b2, 1, inter_p, jnp.float32),
        pad2(w3, inter_p, inter_p, jnp.bfloat16),   pad2(b3, 1, inter_p, jnp.float32),
        # Last layer: pad only the contraction dim; keep the true num_classes
        # output width so the HBM writeback is not inflated 128/num_classes x.
        pad2(w4, inter_p, num_classes, jnp.bfloat16), pad2(b4, 1, num_classes, jnp.float32),
    )


def neural_layer_forward(x, prepared_params, *, block_b=2048):
    """Fused 4-layer MLP forward.

    x: (B, input_dim) -> (B, num_classes) f32.
    prepared_params: output of prepare_params() (padded bf16 weights, f32 biases).
    """
    w1p, b1p, w2p, b2p, w3p, b3p, w4p, b4p = prepared_params
    B, input_dim = x.shape
    assert w1p.shape[0] == input_dim
    inter_p = w2p.shape[0]
    num_classes = w4p.shape[1]

    # bf16 matmul policy: feed x to the MXU as bf16.
    x = x.astype(jnp.bfloat16)

    # Batch tile: big tiles to amortize the ~0.35 us per-grid-step overhead,
    # but keep >= 2 grid steps when the batch allows it so the "parallel"
    # batch axis can shard across v7x's two TensorCores.
    if B <= 16:
        tb = B                                   # tiny batch: single step
    else:
        tb = min(block_b, _round_up(pl.cdiv(B, 2), 8))
        tb = min(tb, B)
    grid = (pl.cdiv(B, tb),)

    # Weights/biases stay VMEM-resident across grid steps; constant block index
    # -> single-buffer them (halves their VMEM footprint vs default 2x).
    def resident(shape):
        return pl.BlockSpec(shape, lambda i: (0, 0), pipeline_mode=pl.Buffered(1))

    in_specs = [
        pl.BlockSpec((tb, input_dim), lambda i: (i, 0)),
        resident(w1p.shape), resident(b1p.shape),
        resident(w2p.shape), resident(b2p.shape),
        resident(w3p.shape), resident(b3p.shape),
        resident(w4p.shape), resident(b4p.shape),
    ]
    # Output block last dim = full num_classes (legal even when < 128): masked
    # vst in-kernel, but ~32x less writeback DMA and no padded-slab slice.
    out_spec = pl.BlockSpec((tb, num_classes), lambda i: (i, 0))

    # Explicit scoped-VMEM request computed from the actual footprint (keeps
    # big tb viable under v5e's 16 MiB default; clamped for v7x's 64 MiB VMEM).
    weight_bytes = sum(int(a.size) * a.dtype.itemsize
                       for a in (w1p, b1p, w2p, b2p, w3p, b3p, w4p, b4p))
    io_bytes = 2 * tb * input_dim * 2 + 2 * tb * num_classes * 4  # dbl-buffered x/out
    act_bytes = 4 * tb * inter_p * 4                              # f32 activation working set
    vmem_limit = int(1.5 * (weight_bytes + io_bytes + act_bytes)) + (2 << 20)
    vmem_limit = min(64 << 20, max(4 << 20, vmem_limit))

    return pl.pallas_call(
        _mlp_kernel,
        out_shape=jax.ShapeDtypeStruct((B, num_classes), jnp.float32),
        grid=grid,
        in_specs=in_specs,
        out_specs=out_spec,
        compiler_params=pltpu.CompilerParams(
            dimension_semantics=("parallel",),
            vmem_limit_bytes=vmem_limit),
    )(x, w1p, b1p, w2p, b2p, w3p, b3p, w4p, b4p)


def init_params(key, input_dim, inter_dim, num_classes):
    """Deterministic init mirroring nn.Linear's default U(-1/sqrt(fan_in), 1/sqrt(fan_in)).
    Weights stored as (in_features, out_features), f32."""
    dims = [(input_dim, inter_dim), (inter_dim, inter_dim),
            (inter_dim, inter_dim), (inter_dim, num_classes)]
    params = []
    for (fan_in, fan_out) in dims:
        key, kw, kb = jax.random.split(key, 3)
        bound = 1.0 / (fan_in ** 0.5)
        w = jax.random.uniform(kw, (fan_in, fan_out), jnp.float32, -bound, bound)
        b = jax.random.uniform(kb, (1, fan_out), jnp.float32, -bound, bound)
        params += [w, b]
    return params


def reference_forward(x, params):
    """XLA reference with the same bf16-matmul / f32-accumulate precision policy.
    # TODO(synk): bf16 matmul inputs are an intentional deviation from a pure-f32
    # PyTorch Linear stack (error compounds over 4 layers)."""
    w1, b1, w2, b2, w3, b3, w4, b4 = params

    def lin(a, w, b):
        return jnp.dot(a.astype(jnp.bfloat16), w.astype(jnp.bfloat16),
                       preferred_element_type=jnp.float32) + b

    h = jnp.maximum(lin(x, w1, b1), 0.0)
    h = jnp.maximum(lin(h, w2, b2), 0.0)
    h = jnp.maximum(lin(h, w3, b3), 0.0)
    return lin(h, w4, b4)


if __name__ == "__main__":
    key = jax.random.PRNGKey(0)
    batch = 8
    input_dim = 16        # e.g. Adult-dataset tabular features
    inter_dim = 32
    num_classes = 4

    key, kx = jax.random.split(key)
    x = jax.random.normal(kx, (batch, input_dim), jnp.float32)
    params = init_params(key, input_dim, inter_dim, num_classes)

    # One-time parameter preparation (padding + bf16 cast) outside the forward.
    prepared = jax.tree.map(jax.block_until_ready, prepare_params(params))

    fwd = jax.jit(neural_layer_forward)
    out = fwd(x, prepared)
    out = jax.block_until_ready(out)

    ref = reference_forward(x, params)
    assert out.shape == (batch, num_classes)
    assert jnp.allclose(out, ref, atol=2e-3, rtol=2e-3), (
        float(jnp.max(jnp.abs(out - ref))))
    print("KERNEL_OK")
</pallas_src>

<mosaic_0001>
module attributes {stable_mosaic.version = 11 : i64} {
  func.func @_mlp_kernel(%arg0: i32, %arg1: memref<8x16xbf16, #tpu.memory_space<vmem>>, %arg2: memref<16x128xbf16, #tpu.memory_space<vmem>>, %arg3: memref<1x128xf32, #tpu.memory_space<vmem>>, %arg4: memref<128x128xbf16, #tpu.memory_space<vmem>>, %arg5: memref<1x128xf32, #tpu.memory_space<vmem>>, %arg6: memref<128x128xbf16, #tpu.memory_space<vmem>>, %arg7: memref<1x128xf32, #tpu.memory_space<vmem>>, %arg8: memref<128x4xbf16, #tpu.memory_space<vmem>>, %arg9: memref<1x4xf32, #tpu.memory_space<vmem>>, %arg10: memref<8x4xf32, #tpu.memory_space<vmem>>) attributes {dimension_semantics = [#tpu.dimension_semantics<parallel>], iteration_bounds = array<i64: 1>, scalar_prefetch = 0 : i64, scratch_operands = 0 : i64, tpu.core_type = #tpu.core_type<tc>, window_params = [{transform_indices = @transform_0, window_bounds = array<i64: 8, 16>}, {pipeline_mode = #tpu.pipeline_mode<synchronous>, transform_indices = @transform_1, window_bounds = array<i64: 16, 128>}, {pipeline_mode = #tpu.pipeline_mode<synchronous>, transform_indices = @transform_2, window_bounds = array<i64: 1, 128>}, {pipeline_mode = #tpu.pipeline_mode<synchronous>, transform_indices = @transform_3, window_bounds = array<i64: 128, 128>}, {pipeline_mode = #tpu.pipeline_mode<synchronous>, transform_indices = @transform_4, window_bounds = array<i64: 1, 128>}, {pipeline_mode = #tpu.pipeline_mode<synchronous>, transform_indices = @transform_5, window_bounds = array<i64: 128, 128>}, {pipeline_mode = #tpu.pipeline_mode<synchronous>, transform_indices = @transform_6, window_bounds = array<i64: 1, 128>}, {pipeline_mode = #tpu.pipeline_mode<synchronous>, transform_indices = @transform_7, window_bounds = array<i64: 128, 4>}, {pipeline_mode = #tpu.pipeline_mode<synchronous>, transform_indices = @transform_8, window_bounds = array<i64: 1, 4>}, {transform_indices = @transform_9, window_bounds = array<i64: 8, 4>}]} {
    %c0 = arith.constant 0 : index
    %c0_0 = arith.constant 0 : index
    %0 = vector.load %arg1[%c0, %c0_0] : memref<8x16xbf16, #tpu.memory_space<vmem>>, vector<8x16xbf16>
    %c0_1 = arith.constant 0 : index
    %c0_2 = arith.constant 0 : index
    %1 = vector.load %arg2[%c0_1, %c0_2] : memref<16x128xbf16, #tpu.memory_space<vmem>>, vector<16x128xbf16>
    %cst = arith.constant dense<0.000000e+00> : vector<8x128xf32>
    %2 = tpu.matmul %0, %1, %cst {dimension_numbers = #tpu.dot_dimension_numbers<[1], [0], [0], [1], [0, 0, 1, 1], [], []>} : vector<8x16xbf16>, vector<16x128xbf16>, vector<8x128xf32> -> vector<8x128xf32>
    %c0_3 = arith.constant 0 : index
    %c0_4 = arith.constant 0 : index
    %3 = vector.load %arg3[%c0_3, %c0_4] : memref<1x128xf32, #tpu.memory_space<vmem>>, vector<1x128xf32>
    %4 = vector.broadcast %3 : vector<1x128xf32> to vector<8x128xf32>
    %5 = arith.addf %2, %4 : vector<8x128xf32>
    %cst_5 = arith.constant 0.000000e+00 : f32
    %6 = vector.broadcast %cst_5 : f32 to vector<8x128xf32>
    %7 = arith.maximumf %5, %6 : vector<8x128xf32>
    %8 = arith.truncf %7 : vector<8x128xf32> to vector<8x128xbf16>
    %c0_6 = arith.constant 0 : index
    %c0_7 = arith.constant 0 : index
    %9 = vector.load %arg4[%c0_6, %c0_7] : memref<128x128xbf16, #tpu.memory_space<vmem>>, vector<128x128xbf16>
    %cst_8 = arith.constant dense<0.000000e+00> : vector<8x128xf32>
    %10 = tpu.matmul %8, %9, %cst_8 {dimension_numbers = #tpu.dot_dimension_numbers<[1], [0], [0], [1], [0, 0, 1, 1], [], []>} : vector<8x128xbf16>, vector<128x128xbf16>, vector<8x128xf32> -> vector<8x128xf32>
    %c0_9 = arith.constant 0 : index
    %c0_10 = arith.constant 0 : index
    %11 = vector.load %arg5[%c0_9, %c0_10] : memref<1x128xf32, #tpu.memory_space<vmem>>, vector<1x128xf32>
    %12 = vector.broadcast %11 : vector<1x128xf32> to vector<8x128xf32>
    %13 = arith.addf %10, %12 : vector<8x128xf32>
    %cst_11 = arith.constant 0.000000e+00 : f32
    %14 = vector.broadcast %cst_11 : f32 to vector<8x128xf32>
    %15 = arith.maximumf %13, %14 : vector<8x128xf32>
    %16 = arith.truncf %15 : vector<8x128xf32> to vector<8x128xbf16>
    %c0_12 = arith.constant 0 : index
    %c0_13 = arith.constant 0 : index
    %17 = vector.load %arg6[%c0_12, %c0_13] : memref<128x128xbf16, #tpu.memory_space<vmem>>, vector<128x128xbf16>
    %cst_14 = arith.constant dense<0.000000e+00> : vector<8x128xf32>
    %18 = tpu.matmul %16, %17, %cst_14 {dimension_numbers = #tpu.dot_dimension_numbers<[1], [0], [0], [1], [0, 0, 1, 1], [], []>} : vector<8x128xbf16>, vector<128x128xbf16>, vector<8x128xf32> -> vector<8x128xf32>
    %c0_15 = arith.constant 0 : index
    %c0_16 = arith.constant 0 : index
    %19 = vector.load %arg7[%c0_15, %c0_16] : memref<1x128xf32, #tpu.memory_space<vmem>>, vector<1x128xf32>
    %20 = vector.broadcast %19 : vector<1x128xf32> to vector<8x128xf32>
    %21 = arith.addf %18, %20 : vector<8x128xf32>
    %cst_17 = arith.constant 0.000000e+00 : f32
    %22 = vector.broadcast %cst_17 : f32 to vector<8x128xf32>
    %23 = arith.maximumf %21, %22 : vector<8x128xf32>
    %24 = arith.truncf %23 : vector<8x128xf32> to vector<8x128xbf16>
    %c0_18 = arith.constant 0 : index
    %c0_19 = arith.constant 0 : index
    %25 = vector.load %arg8[%c0_18, %c0_19] : memref<128x4xbf16, #tpu.memory_space<vmem>>, vector<128x4xbf16>
    %cst_20 = arith.constant dense<0.000000e+00> : vector<8x4xf32>
    %26 = tpu.matmul %24, %25, %cst_20 {dimension_numbers = #tpu.dot_dimension_numbers<[1], [0], [0], [1], [0, 0, 1, 1], [], []>} : vector<8x128xbf16>, vector<128x4xbf16>, vector<8x4xf32> -> vector<8x4xf32>
    %c0_21 = arith.constant 0 : index
    %c0_22 = arith.constant 0 : index
    %27 = vector.load %arg9[%c0_21, %c0_22] : memref<1x4xf32, #tpu.memory_space<vmem>>, vector<1x4xf32>
    %28 = vector.broadcast %27 : vector<1x4xf32> to vector<8x4xf32>
    %29 = arith.addf %26, %28 : vector<8x4xf32>
    %c0_23 = arith.constant 0 : index
    %c0_24 = arith.constant 0 : index
    %30 = vector.load %arg10[%c0_23, %c0_24] : memref<8x4xf32, #tpu.memory_space<vmem>>, vector<8x4xf32>
    tpu.vector_store %arg10[%c0_23, %c0_24], %29 {strides = array<i32>} : memref<8x4xf32, #tpu.memory_space<vmem>>, vector<8x4xf32>,
    return
  }
  func.func @transform_0(%arg0: i32) -> (i32, i32) {
    %c0_i32 = arith.constant 0 : i32
    %c0_i32_0 = arith.constant 0 : i32
    return %arg0, %c0_i32 : i32, i32
  }
  func.func @transform_1(%arg0: i32) -> (i32, i32) {
    %c0_i32 = arith.constant 0 : i32
    %c0_i32_0 = arith.constant 0 : i32
    %c0_i32_1 = arith.constant 0 : i32
    return %c0_i32, %c0_i32_0 : i32, i32
  }
  func.func @transform_2(%arg0: i32) -> (i32, i32) {
    %c0_i32 = arith.constant 0 : i32
    %c0_i32_0 = arith.constant 0 : i32
    %c0_i32_1 = arith.constant 0 : i32
    return %c0_i32, %c0_i32_0 : i32, i32
  }
  func.func @transform_3(%arg0: i32) -> (i32, i32) {
    %c0_i32 = arith.constant 0 : i32
    %c0_i32_0 = arith.constant 0 : i32
    %c0_i32_1 = arith.constant 0 : i32
    return %c0_i32, %c0_i32_0 : i32, i32
  }
  func.func @transform_4(%arg0: i32) -> (i32, i32) {
    %c0_i32 = arith.constant 0 : i32
    %c0_i32_0 = arith.constant 0 : i32
    %c0_i32_1 = arith.constant 0 : i32
    return %c0_i32, %c0_i32_0 : i32, i32
  }
  func.func @transform_5(%arg0: i32) -> (i32, i32) {
    %c0_i32 = arith.constant 0 : i32
    %c0_i32_0 = arith.constant 0 : i32
    %c0_i32_1 = arith.constant 0 : i32
    return %c0_i32, %c0_i32_0 : i32, i32
  }
  func.func @transform_6(%arg0: i32) -> (i32, i32) {
    %c0_i32 = arith.constant 0 : i32
    %c0_i32_0 = arith.constant 0 : i32
    %c0_i32_1 = arith.constant 0 : i32
    return %c0_i32, %c0_i32_0 : i32, i32
  }
  func.func @transform_7(%arg0: i32) -> (i32, i32) {
    %c0_i32 = arith.constant 0 : i32
    %c0_i32_0 = arith.constant 0 : i32
    %c0_i32_1 = arith.constant 0 : i32
    return %c0_i32, %c0_i32_0 : i32, i32
  }
  func.func @transform_8(%arg0: i32) -> (i32, i32) {
    %c0_i32 = arith.constant 0 : i32
    %c0_i32_0 = arith.constant 0 : i32
    %c0_i32_1 = arith.constant 0 : i32
    return %c0_i32, %c0_i32_0 : i32, i32
  }
  func.func @transform_9(%arg0: i32) -> (i32, i32) {
    %c0_i32 = arith.constant 0 : i32
    %c0_i32_0 = arith.constant 0 : i32
    return %arg0, %c0_i32 : i32, i32
  }
}

</mosaic_0001>

<bundles_post_ra>
// kernel: neural_layer_forward.1
= control target key start
LH: loop header
LB: loop body
LE: loop exit
PB: predicated region body
PF: predicated region fallthrough
CT: control target
= control target key end

     0   :  { %14 = vsyncpa [#allocation3], 0  ;;  %s630_s30 = smov [#allocation2]   ;;  %s790_s0 = inlined_call_operand.vmem [shape: bf16[8,16], index: 0, kind: input, shape index: {}]   ;;  %s791_s1 = inlined_call_operand.vmem [shape: bf16[16,128], index: 1, kind: input, shape index: {}]   ;;  %s792_s2 = inlined_call_operand.vmem [shape: f32[1,128], index: 2, kind: input, shape index: {}]   ;;  %s793_s3 = inlined_call_operand.vmem [shape: bf16[128,128], index: 3, kind: input, shape index: {}]   ;;  %s794_s4 = inlined_call_operand.vmem [shape: f32[1,128], index: 4, kind: input, shape index: {}]   ;;  %s795_s5 = inlined_call_operand.hbm [shape: bf16[128,128], index: 5, kind: input, shape index: {}]   ;;  %s796_s6 = inlined_call_operand.vmem [shape: f32[1,128], index: 6, kind: input, shape index: {}]   ;;  %s797_s7 = inlined_call_operand.vmem [shape: bf16[128,4], index: 7, kind: input, shape index: {}]   ;;  %s798_s8 = inlined_call_operand.vmem [shape: f32[1,4], index: 8, kind: input, shape index: {}]   ;;  %s799_s9 = inlined_call_operand.vmem [shape: f32[8,4], index: 9, kind: output, shape index: {}]  }
   0x1   :  { %s30_s10 = sshll.u32 %s630_s30, 4  ;;  %s31_s10 = int_to_ptr.vmem [resolvable:$true] %s30_s10 }
   0x2   :  { %s616_s11 = scalar_lea.vmem %s31_s10, 1024  ;;  %p621_p1 = scmp.lt.s32.totalorder %s31_s10, %s31_s10 }
   0x3   :  { %p617_p0 = scmp.ne.s32.totalorder %s31_s10, %s616_s11  ;;  %p622_p2 = scmp.lt.s32.totalorder %s616_s11, %s616_s11 }
   0x5   :  { %p623_p3 = por %p622_p2, %p621_p1 }
   0x7   :  { %p624_p4 = pnand %p623_p3, %p617_p0 }
   0x9   :  { %627 = shalt.err (!%p624_p4)
}
   0xa   :  { %s631_s12 = smov 64   ;;  %s632_s13 = smov 4  }
   0xb   :  { %36 = dma.hbm_to_vmem [thread:$0]  %s795_s5, 1024, %s31_s10, [#allocation3], %s631_s12, %s631_s12, %s632_s13  }
   0xc   :  { %628 = dma.done.wait [#allocation3], 1024  }
   0xd   :  { %629 = vsyncadd [#allocation3], 4294966272  ;;  %v633_v0 = vmov 0.0   ;;  %vm634_vm0 = vmmov 0   ;;  %v583_v1 = vld [vmem:[%s791_s1] sm:$0xff]   ;;  %vm63_vm1 = vcmask 130048  }
   0xe   :  { %512 = vmatprep.subr.bf16.mxu0 %v633_v0  ;;  %514 = vmatprep.mubr.msk.bf16.mxu0 %vm634_vm0, %v633_v0  ;;  %v47_v2 = vld [vmem:[%s790_s0] sm:$0xf]  ;;  %v584_v3 = vld [vmem:[%s793_s3 + $0x38] sm:$0xff]   ;;  %v585_v4 = vld [vmem:[%s793_s3 + $0x30] sm:$0xff]   ;;  %vm446_vm2 = vcmask 31744  }
   0xf   :  { %518 = vmatprep.subr.bf16.mxu1 %v633_v0  ;;  %534 = vmatprep.mubr.msk.bf16.mxu1 %vm634_vm0, %v633_v0  ;;  %v586_v5 = vld [vmem:[%s793_s3 + $0x28] sm:$0xff]   ;;  %v587_v6 = vld [vmem:[%s793_s3 + $0x20] sm:$0xff]   ;;  %v588_v7 = vld [vmem:[%s793_s3 + $0x18] sm:$0xff]  }
  0x10   :  { %513 = vmatpush3.bf16.msra.mxu0 %v583_v1  ;;  %519 = vmatpush3.bf16.msra.mxu1 %v584_v3  ;;  %v589_v8 = vld [vmem:[%s793_s3 + $0x10] sm:$0xff]   ;;  %v590_v9 = vld [vmem:[%s793_s3 + $0x8] sm:$0xff]   ;;  %v591_v10 = vld [vmem:[%s793_s3] sm:$0xff]  }
  0x11   :  { %538 = vmatprep.subr.bf16.mxu0 %v633_v0  ;;  %520 = vmatprep.subr.bf16.mxu1 %v633_v0  ;;  %v592_v11 = vld [vmem:[#allocation2 + $0x38] sm:$0xff]   ;;  %v593_v12 = vld [vmem:[#allocation2 + $0x30] sm:$0xff]   ;;  %v594_v13 = vld [vmem:[#allocation2 + $0x28] sm:$0xff]  }
  0x12   :  { %v595_v14 = vld [vmem:[#allocation2 + $0x20] sm:$0xff]   ;;  %v596_v15 = vld [vmem:[#allocation2 + $0x18] sm:$0xff]   ;;  %v597_v16 = vld [vmem:[#allocation2 + $0x10] sm:$0xff]  }
  0x13   :  { %515 = vmatmul.mubr.msk.bf16.vlgmr.msra.gmra.mxu0 %vm63_vm1, %v47_v2  ;;  %v453_v17 = vld [vmem:[%s792_s2] ss:$0 sm:$0xff]  ;;  %v598_v25 = vld [vmem:[#allocation2 + $0x8] sm:$0xff]   ;;  %v600_v27 = vld [vmem:[%s797_s7 + $0x38] sm:$0xff]  }
  0x14   :  { %554 = vmatprep.mubr.msk.bf16.mxu0 %vm634_vm0, %v633_v0  ;;  %521 = vmatpush3.bf16.msra.mxu1 %v585_v4  ;;  %v599_v26 = vld [vmem:[#allocation2] sm:$0xff]   ;;  %v601_v28 = vld [vmem:[%s797_s7 + $0x30] sm:$0xff]   ;;  %v602_v29 = vld [vmem:[%s797_s7 + $0x28] sm:$0xff]  }
  0x15   :  { %522 = vmatprep.subr.bf16.mxu1 %v633_v0  ;;  %539 = vmatpush3.bf16.msra.mxu0 %v592_v11  ;;  %v603_v30 = vld [vmem:[%s797_s7 + $0x20] sm:$0xff]   ;;  %v604_v31 = vld [vmem:[%s797_s7 + $0x18] sm:$0xff]   ;;  %v605_v32 = vld [vmem:[%s797_s7 + $0x10] sm:$0xff]  }
  0x16   :  { %540 = vmatprep.subr.bf16.mxu0 %v633_v0  ;;  %v456_v33 = vld [vmem:[%s794_s4] ss:$0 sm:$0xff]  ;;  %v606_v41 = vld [vmem:[%s797_s7 + $0x8] sm:$0xff]  }
  0x17   :  { %v607_v42 = vld [vmem:[%s797_s7] sm:$0xff]  }
  0x18   :  { %523 = vmatpush3.bf16.msra.mxu1 %v586_v5  ;;  %v465_v43 = vld [vmem:[%s796_s6] ss:$0 sm:$0xff] }
  0x19   :  { %524 = vmatprep.subr.bf16.mxu1 %v633_v0  ;;  %541 = vmatpush3.bf16.msra.mxu0 %v593_v12  ;;  %v474_v51 = vld [vmem:[%s798_s8] ss:$0 sm:$0xff] }
  0x1a   :  { %542 = vmatprep.subr.bf16.mxu0 %v633_v0 }
  0x1c   :  { %525 = vmatpush3.bf16.msra.mxu1 %v587_v6 }
  0x1d   :  { %526 = vmatprep.subr.bf16.mxu1 %v633_v0  ;;  %543 = vmatpush3.bf16.msra.mxu0 %v594_v13 }
  0x1e   :  { %544 = vmatprep.subr.bf16.mxu0 %v633_v0 }
  0x20   :  { %527 = vmatpush3.bf16.msra.mxu1 %v588_v7 }
  0x21   :  { %528 = vmatprep.subr.bf16.mxu1 %v633_v0  ;;  %545 = vmatpush3.bf16.msra.mxu0 %v595_v14 }
  0x22   :  { %546 = vmatprep.subr.bf16.mxu0 %v633_v0 }
  0x24   :  { %529 = vmatpush3.bf16.msra.mxu1 %v589_v8 }
  0x25   :  { %530 = vmatprep.subr.bf16.mxu1 %v633_v0  ;;  %547 = vmatpush3.bf16.msra.mxu0 %v596_v15 }
  0x26   :  { %548 = vmatprep.subr.bf16.mxu0 %v633_v0 }
  0x28   :  { %531 = vmatpush3.bf16.msra.mxu1 %v590_v9 }
  0x29   :  { %532 = vmatprep.subr.bf16.mxu1 %v633_v0  ;;  %549 = vmatpush3.bf16.msra.mxu0 %v597_v16 }
  0x2a   :  { %550 = vmatprep.subr.bf16.mxu0 %v633_v0 }
  0x2c   :  { %533 = vmatpush3.bf16.msra.mxu1 %v591_v10 }
  0x2d   :  { %558 = vmatprep.subr.bf16.mxu1 %v633_v0  ;;  %551 = vmatpush3.bf16.msra.mxu0 %v598_v25 }
  0x2e   :  { %552 = vmatprep.subr.bf16.mxu0 %v633_v0 }
  0x31   :  { %553 = vmatpush3.bf16.msra.mxu0 %v599_v26 }
  0xd3   :  { %v101_v18 = vpop.f32.mrf.mxu0 }
  0xd4   :  { %v102_v19 = vadd.f32 %v453_v17, %v101_v18 }
  0xd5   :  { %v516_v20 = vpop.f32.mrf.mxu0 }
  0xd6   :  { %v107_v21 = vmax.f32 %v102_v19, 0.0 }
  0xd7   :  { %v104_v22 = vpop.f32.mrf.mxu0 }
  0xd8   :  { %v108_v23 = vpack.c.bf16 %v107_v21, %v107_v21 }
  0xd9   :  { %v517_v24 = vpop.f32.mrf.mxu0 }
  0xda   :  { %535 = vmatmul.mubr.bf16.vlgmr.msra.gmra.mxu1 %v108_v23 }
  0xdb   :  { %574 = vmatprep.mubr.msk.bf16.mxu1 %vm634_vm0, %v633_v0  ;;  %559 = vmatpush3.bf16.msra.mxu1 %v600_v27 }
  0xdc   :  { %560 = vmatprep.subr.bf16.mxu1 %v633_v0 }
  0xdf   :  { %561 = vmatpush3.bf16.msra.mxu1 %v601_v28 }
  0xe0   :  { %562 = vmatprep.subr.bf16.mxu1 %v633_v0 }
  0xe3   :  { %563 = vmatpush3.bf16.msra.mxu1 %v602_v29 }
  0xe4   :  { %564 = vmatprep.subr.bf16.mxu1 %v633_v0 }
  0xe7   :  { %565 = vmatpush3.bf16.msra.mxu1 %v603_v30 }
  0xe8   :  { %566 = vmatprep.subr.bf16.mxu1 %v633_v0 }
  0xeb   :  { %567 = vmatpush3.bf16.msra.mxu1 %v604_v31 }
  0xec   :  { %568 = vmatprep.subr.bf16.mxu1 %v633_v0 }
  0xef   :  { %569 = vmatpush3.bf16.msra.mxu1 %v605_v32 }
  0xf0   :  { %570 = vmatprep.subr.bf16.mxu1 %v633_v0 }
  0xf3   :  { %571 = vmatpush3.bf16.msra.mxu1 %v606_v41 }
  0xf4   :  { %572 = vmatprep.subr.bf16.mxu1 %v633_v0 }
  0xf7   :  { %573 = vmatpush3.bf16.msra.mxu1 %v607_v42 }
 0x19a   :  { %v214_v34 = vpop.f32.mrf.mxu1 }
 0x19b   :  { %v215_v35 = vadd.f32 %v456_v33, %v214_v34 }
 0x19c   :  { %v536_v36 = vpop.f32.mrf.mxu1 }
 0x19d   :  { %v220_v37 = vmax.f32 %v215_v35, 0.0 }
 0x19e   :  { %v217_v38 = vpop.f32.mrf.mxu1 }
 0x19f   :  { %v221_v39 = vpack.c.bf16 %v220_v37, %v220_v37 }
 0x1a0   :  { %v537_v40 = vpop.f32.mrf.mxu1 }
 0x1a1   :  { %555 = vmatmul.mubr.bf16.vlgmr.msra.gmra.mxu0 %v221_v39 }
 0x261   :  { %v327_v44 = vpop.f32.mrf.mxu0 }
 0x262   :  { %v328_v45 = vadd.f32 %v465_v43, %v327_v44 }
 0x263   :  { %v556_v46 = vpop.f32.mrf.mxu0 }
 0x264   :  { %v333_v47 = vmax.f32 %v328_v45, 0.0 }
 0x265   :  { %v330_v48 = vpop.f32.mrf.mxu0 }
 0x266   :  { %v334_v49 = vpack.c.bf16 %v333_v47, %v333_v47 }
 0x267   :  { %v557_v50 = vpop.f32.mrf.mxu0 }
 0x268   :  { %575 = vmatmul.mubr.bf16.vlgmr.msra.gmra.mxu1 %v334_v49 }
 0x328   :  { %v440_v52 = vpop.f32.mrf.mxu1 }
 0x329   :  { %v441_v53 = vadd.f32 %v474_v51, %v440_v52 }
 0x32a   :  { %v576_v54 = vpop.f32.mrf.mxu1 }
 0x32b   :  { %447 = vst.msk [vmem:[%s799_s9] sm:$0xff] %vm446_vm2, %v441_v53 }
 0x32c   :  { %v443_v55 = vpop.f32.mrf.mxu1 }
 0x32e   :  { %v577_v56 = vpop.f32.mrf.mxu1 }
 0x32f   :  { %452 = vsyncpa [#allocation3], 1 }

</bundles_post_ra>
